<compile_context>
chip_gen: v6e
topology: v6e:2x2x1
jax: 0.10.0
libtpu: 0.0.40
codegen_flags: <defaults>
</compile_context>

<pallas_src>
import jax
import jax.numpy as jnp
from jax.experimental import pallas as pl
from jax.experimental.pallas import tpu as pltpu

LANE = 128
MAX_TM = 1024   # batch tile used only when the batch does not fit in one step


def _round_up(x, m):
    return (x + m - 1) // m * m


def _make_lenet_kernel(num_layers):
    """Fused MLP kernel: num_layers Linear layers with ReLU between them."""

    def kernel(*refs):
        x_ref = refs[0]
        o_ref = refs[-1]
        p_refs = refs[1:-1]                 # (w0, b0, w1, b1, ..., wL-1, bL-1)

        # In-kernel f32 -> bf16 cast: hidden under the x-tile DMA, avoids a
        # standalone XLA cast op and an extra HBM round trip in the wrapper.
        h = x_ref[...].astype(jnp.bfloat16)

        for l in range(num_layers):
            w_ref = p_refs[2 * l]           # (in_pad, out_pad) bf16, VMEM-resident
            b_ref = p_refs[2 * l + 1]       # (1, out_pad) f32
            acc = jnp.dot(h, w_ref[...],
                          preferred_element_type=jnp.float32) + b_ref[...]
            if l < num_layers - 1:
                # Bias add + ReLU in f32 on the accumulator (VPU); back to bf16
                # only for the next MXU pass.
                h = jnp.maximum(acc, 0.0).astype(jnp.bfloat16)
            else:
                o_ref[...] = acc.astype(o_ref.dtype)

    return kernel


def prepare_lenet_params(weights, biases, param_dtype=jnp.bfloat16):
    """One-time (outside the hot path) parameter preparation.

    weights[i]: (out_i, in_i) float32  -- PyTorch nn.Linear layout
    biases[i]:  (out_i,)      float32

    Returns [(w_pad, b_pad), ...] with
      w_pad: (in_pad, out_pad) bf16 (transposed, zero-padded so every output
             width is a multiple of 128 and input widths chain consistently;
             the very first layer keeps its native K),
      b_pad: (1, out_pad) float32.
    """
    prepared = []
    prev_out_pad = None
    for i, (w, b) in enumerate(zip(weights, biases)):
        out_f, in_f = w.shape
        in_pad = in_f if i == 0 else prev_out_pad   # first layer keeps native K
        out_pad = _round_up(out_f, LANE)

        w_p = jnp.zeros((in_pad, out_pad), dtype=param_dtype)
        w_p = w_p.at[:in_f, :out_f].set(w.T.astype(param_dtype))
        b_p = jnp.zeros((1, out_pad), dtype=jnp.float32)
        b_p = b_p.at[0, :out_f].set(b.astype(jnp.float32))

        prepared.append((w_p, b_p))
        prev_out_pad = out_pad
    return prepared


def lenet_forward(x, prepared_params):
    """Fused LeNet (MLP) forward.

    x: (M, input_dim) f32.
    Returns the lane-dense logits slab (M, out_pad) f32.  Consumers should
    slice `[:, :output_dim]` lazily (kept out of the kernel path so the store
    stays an unmasked, 128-wide vst and no extra post-call HBM copy is forced).
    """
    M, K = x.shape
    num_layers = len(prepared_params)
    out_pad = prepared_params[-1][0].shape[1]
    assert prepared_params[0][0].shape[0] == K, "x feature dim mismatch"

    if M <= MAX_TM:
        # Whole batch in one grid step: block == full array (no (8,128)
        # divisibility requirement), no batch padding, no per-step overhead.
        TM, M_pad = M, M
    else:
        TM = MAX_TM
        M_pad = _round_up(M, TM)
        if M_pad != M:
            x = jnp.pad(x, ((0, M_pad - M), (0, 0)))   # only for very large M

    grid = (M_pad // TM,)

    in_specs = [pl.BlockSpec((TM, K), lambda i: (i, 0))]
    flat_params = []
    for (w_p, b_p) in prepared_params:
        # Constant index_map -> params stay VMEM-resident across grid steps.
        in_specs.append(pl.BlockSpec(w_p.shape, lambda i: (0, 0)))
        in_specs.append(pl.BlockSpec(b_p.shape, lambda i: (0, 0)))
        flat_params += [w_p, b_p]

    out_specs = pl.BlockSpec((TM, out_pad), lambda i: (i, 0))

    # Advisory cost estimate for XLA's scheduler.
    flops = 0
    bytes_accessed = x.size * x.dtype.itemsize + M_pad * out_pad * 4
    for (w_p, b_p) in prepared_params:
        flops += 2 * M_pad * w_p.shape[0] * w_p.shape[1]
        bytes_accessed += w_p.size * w_p.dtype.itemsize + b_p.size * 4

    out = pl.pallas_call(
        _make_lenet_kernel(num_layers),
        out_shape=jax.ShapeDtypeStruct((M_pad, out_pad), jnp.float32),
        grid_spec=pltpu.PrefetchScalarGridSpec(
            num_scalar_prefetch=0,
            grid=grid,
            in_specs=in_specs,
            out_specs=out_specs,
        ),
        compiler_params=pltpu.CompilerParams(
            # Single-step grids gain nothing from "parallel"; multi-tile grids
            # mark the independent M tiles as parallel.
            dimension_semantics=("arbitrary",) if grid[0] == 1 else ("parallel",),
        ),
        cost_estimate=pl.CostEstimate(
            flops=flops, transcendentals=0, bytes_accessed=bytes_accessed),
    )(x, *flat_params)

    if M_pad != M:
        out = out[:M]
    return out


if __name__ == "__main__":
    key = jax.random.PRNGKey(0)

    # LeNet(hidden_dims=[128, 64], input_dim=784, output_dim=10), small batch.
    input_dim, hidden_dims, output_dim = 784, [128, 64], 10
    batch = 32

    dims = [input_dim] + hidden_dims + [output_dim]
    weights, biases = [], []
    for l in range(len(dims) - 1):
        key, kw, kb = jax.random.split(key, 3)
        fan_in, fan_out = dims[l], dims[l + 1]
        bound = 1.0 / jnp.sqrt(jnp.float32(fan_in))
        weights.append(jax.random.uniform(
            kw, (fan_out, fan_in), dtype=jnp.float32, minval=-bound, maxval=bound))
        biases.append(jax.random.uniform(
            kb, (fan_out,), dtype=jnp.float32, minval=-bound, maxval=bound))

    key, kx = jax.random.split(key)
    x = jax.random.normal(kx, (batch, input_dim), dtype=jnp.float32)

    params = prepare_lenet_params(weights, biases)   # one-time prep (transpose/pad/bf16)
    slab = lenet_forward(x, params)                  # (batch, 128) lane-dense slab
    slab = jax.block_until_ready(slab)
    y = slab[:, :output_dim]                         # lazy consumer-side slice

    # Reference with matching precision policy (bf16 weights/activations, f32 accum).
    h = x.astype(jnp.bfloat16)
    for l, (w, b) in enumerate(zip(weights, biases)):
        h = jnp.dot(h, w.T.astype(jnp.bfloat16),
                    preferred_element_type=jnp.float32) + b
        if l < len(weights) - 1:
            h = jnp.maximum(h, 0.0).astype(jnp.bfloat16)
    y_ref = h

    assert y.shape == (batch, output_dim)
    assert jnp.allclose(y, y_ref, atol=2e-2, rtol=2e-2), \
        float(jnp.max(jnp.abs(y - y_ref)))

    # Loose sanity check against the pure-f32 PyTorch-equivalent forward.
    h32 = x
    for l, (w, b) in enumerate(zip(weights, biases)):
        h32 = h32 @ w.T + b
        if l < len(weights) - 1:
            h32 = jnp.maximum(h32, 0.0)
    assert jnp.allclose(y, h32, atol=0.5, rtol=0.1)

    print("KERNEL_OK")
</pallas_src>

<mosaic_0001>
module attributes {stable_mosaic.version = 11 : i64} {
  func.func @kernel(%arg0: i32, %arg1: memref<32x784xf32, #tpu.memory_space<vmem>>, %arg2: memref<784x128xbf16, #tpu.memory_space<vmem>>, %arg3: memref<1x128xf32, #tpu.memory_space<vmem>>, %arg4: memref<128x128xbf16, #tpu.memory_space<vmem>>, %arg5: memref<1x128xf32, #tpu.memory_space<vmem>>, %arg6: memref<128x128xbf16, #tpu.memory_space<vmem>>, %arg7: memref<1x128xf32, #tpu.memory_space<vmem>>, %arg8: memref<32x128xf32, #tpu.memory_space<vmem>>) attributes {dimension_semantics = [#tpu.dimension_semantics<arbitrary>], iteration_bounds = array<i64: 1>, scalar_prefetch = 0 : i64, scratch_operands = 0 : i64, tpu.core_type = #tpu.core_type<tc>, window_params = [{transform_indices = @transform_0, window_bounds = array<i64: 32, 784>}, {pipeline_mode = #tpu.pipeline_mode<synchronous>, transform_indices = @transform_1, window_bounds = array<i64: 784, 128>}, {pipeline_mode = #tpu.pipeline_mode<synchronous>, transform_indices = @transform_2, window_bounds = array<i64: 1, 128>}, {pipeline_mode = #tpu.pipeline_mode<synchronous>, transform_indices = @transform_3, window_bounds = array<i64: 128, 128>}, {pipeline_mode = #tpu.pipeline_mode<synchronous>, transform_indices = @transform_4, window_bounds = array<i64: 1, 128>}, {pipeline_mode = #tpu.pipeline_mode<synchronous>, transform_indices = @transform_5, window_bounds = array<i64: 128, 128>}, {pipeline_mode = #tpu.pipeline_mode<synchronous>, transform_indices = @transform_6, window_bounds = array<i64: 1, 128>}, {transform_indices = @transform_7, window_bounds = array<i64: 32, 128>}]} {
    %c0 = arith.constant 0 : index
    %c0_0 = arith.constant 0 : index
    %0 = vector.load %arg1[%c0, %c0_0] : memref<32x784xf32, #tpu.memory_space<vmem>>, vector<32x784xf32>
    %1 = arith.truncf %0 : vector<32x784xf32> to vector<32x784xbf16>
    %c0_1 = arith.constant 0 : index
    %c0_2 = arith.constant 0 : index
    %2 = vector.load %arg2[%c0_1, %c0_2] : memref<784x128xbf16, #tpu.memory_space<vmem>>, vector<784x128xbf16>
    %cst = arith.constant dense<0.000000e+00> : vector<32x128xf32>
    %3 = tpu.matmul %1, %2, %cst {dimension_numbers = #tpu.dot_dimension_numbers<[1], [0], [0], [1], [0, 0, 1, 1], [], []>} : vector<32x784xbf16>, vector<784x128xbf16>, vector<32x128xf32> -> vector<32x128xf32>
    %c0_3 = arith.constant 0 : index
    %c0_4 = arith.constant 0 : index
    %4 = vector.load %arg3[%c0_3, %c0_4] : memref<1x128xf32, #tpu.memory_space<vmem>>, vector<1x128xf32>
    %5 = vector.broadcast %4 : vector<1x128xf32> to vector<32x128xf32>
    %6 = arith.addf %3, %5 : vector<32x128xf32>
    %cst_5 = arith.constant 0.000000e+00 : f32
    %7 = vector.broadcast %cst_5 : f32 to vector<32x128xf32>
    %8 = arith.maximumf %6, %7 : vector<32x128xf32>
    %9 = arith.truncf %8 : vector<32x128xf32> to vector<32x128xbf16>
    %c0_6 = arith.constant 0 : index
    %c0_7 = arith.constant 0 : index
    %10 = vector.load %arg4[%c0_6, %c0_7] : memref<128x128xbf16, #tpu.memory_space<vmem>>, vector<128x128xbf16>
    %cst_8 = arith.constant dense<0.000000e+00> : vector<32x128xf32>
    %11 = tpu.matmul %9, %10, %cst_8 {dimension_numbers = #tpu.dot_dimension_numbers<[1], [0], [0], [1], [0, 0, 1, 1], [], []>} : vector<32x128xbf16>, vector<128x128xbf16>, vector<32x128xf32> -> vector<32x128xf32>
    %c0_9 = arith.constant 0 : index
    %c0_10 = arith.constant 0 : index
    %12 = vector.load %arg5[%c0_9, %c0_10] : memref<1x128xf32, #tpu.memory_space<vmem>>, vector<1x128xf32>
    %13 = vector.broadcast %12 : vector<1x128xf32> to vector<32x128xf32>
    %14 = arith.addf %11, %13 : vector<32x128xf32>
    %cst_11 = arith.constant 0.000000e+00 : f32
    %15 = vector.broadcast %cst_11 : f32 to vector<32x128xf32>
    %16 = arith.maximumf %14, %15 : vector<32x128xf32>
    %17 = arith.truncf %16 : vector<32x128xf32> to vector<32x128xbf16>
    %c0_12 = arith.constant 0 : index
    %c0_13 = arith.constant 0 : index
    %18 = vector.load %arg6[%c0_12, %c0_13] : memref<128x128xbf16, #tpu.memory_space<vmem>>, vector<128x128xbf16>
    %cst_14 = arith.constant dense<0.000000e+00> : vector<32x128xf32>
    %19 = tpu.matmul %17, %18, %cst_14 {dimension_numbers = #tpu.dot_dimension_numbers<[1], [0], [0], [1], [0, 0, 1, 1], [], []>} : vector<32x128xbf16>, vector<128x128xbf16>, vector<32x128xf32> -> vector<32x128xf32>
    %c0_15 = arith.constant 0 : index
    %c0_16 = arith.constant 0 : index
    %20 = vector.load %arg7[%c0_15, %c0_16] : memref<1x128xf32, #tpu.memory_space<vmem>>, vector<1x128xf32>
    %21 = vector.broadcast %20 : vector<1x128xf32> to vector<32x128xf32>
    %22 = arith.addf %19, %21 : vector<32x128xf32>
    %c0_17 = arith.constant 0 : index
    %c0_18 = arith.constant 0 : index
    %23 = vector.load %arg8[%c0_17, %c0_18] : memref<32x128xf32, #tpu.memory_space<vmem>>, vector<32x128xf32>
    tpu.vector_store %arg8[%c0_17, %c0_18], %22 {strides = array<i32>} : memref<32x128xf32, #tpu.memory_space<vmem>>, vector<32x128xf32>,
    return
  }
  func.func @transform_0(%arg0: i32) -> (i32, i32) {
    %c0_i32 = arith.constant 0 : i32
    %c0_i32_0 = arith.constant 0 : i32
    return %arg0, %c0_i32 : i32, i32
  }
  func.func @transform_1(%arg0: i32) -> (i32, i32) {
    %c0_i32 = arith.constant 0 : i32
    %c0_i32_0 = arith.constant 0 : i32
    %c0_i32_1 = arith.constant 0 : i32
    return %c0_i32, %c0_i32_0 : i32, i32
  }
  func.func @transform_2(%arg0: i32) -> (i32, i32) {
    %c0_i32 = arith.constant 0 : i32
    %c0_i32_0 = arith.constant 0 : i32
    %c0_i32_1 = arith.constant 0 : i32
    return %c0_i32, %c0_i32_0 : i32, i32
  }
  func.func @transform_3(%arg0: i32) -> (i32, i32) {
    %c0_i32 = arith.constant 0 : i32
    %c0_i32_0 = arith.constant 0 : i32
    %c0_i32_1 = arith.constant 0 : i32
    return %c0_i32, %c0_i32_0 : i32, i32
  }
  func.func @transform_4(%arg0: i32) -> (i32, i32) {
    %c0_i32 = arith.constant 0 : i32
    %c0_i32_0 = arith.constant 0 : i32
    %c0_i32_1 = arith.constant 0 : i32
    return %c0_i32, %c0_i32_0 : i32, i32
  }
  func.func @transform_5(%arg0: i32) -> (i32, i32) {
    %c0_i32 = arith.constant 0 : i32
    %c0_i32_0 = arith.constant 0 : i32
    %c0_i32_1 = arith.constant 0 : i32
    return %c0_i32, %c0_i32_0 : i32, i32
  }
  func.func @transform_6(%arg0: i32) -> (i32, i32) {
    %c0_i32 = arith.constant 0 : i32
    %c0_i32_0 = arith.constant 0 : i32
    %c0_i32_1 = arith.constant 0 : i32
    return %c0_i32, %c0_i32_0 : i32, i32
  }
  func.func @transform_7(%arg0: i32) -> (i32, i32) {
    %c0_i32 = arith.constant 0 : i32
    %c0_i32_0 = arith.constant 0 : i32
    return %arg0, %c0_i32 : i32, i32
  }
}

</mosaic_0001>

<bundles_post_ra>
// kernel: tpu_custom_call.1
= control target key start
LH: loop header
LB: loop body
LE: loop exit
PB: predicated region body
PF: predicated region fallthrough
CT: control target
= control target key end

     0   :  { %12 = vsyncpa [#allocation3], 0  ;;  %s1493_s0 = inlined_call_operand.hbm [shape: f32[32,784], index: 0, kind: input, shape index: {}]   ;;  %s1494_s1 = inlined_call_operand.hbm [shape: bf16[784,128], index: 1, kind: input, shape index: {}]   ;;  %s1495_s2 = inlined_call_operand.vmem [shape: f32[1,128], index: 2, kind: input, shape index: {}]   ;;  %s1496_s3 = inlined_call_operand.hbm [shape: bf16[128,128], index: 3, kind: input, shape index: {}]   ;;  %s1497_s4 = inlined_call_operand.vmem [shape: f32[1,128], index: 4, kind: input, shape index: {}]   ;;  %s1498_s5 = inlined_call_operand.hbm [shape: bf16[128,128], index: 5, kind: input, shape index: {}]   ;;  %s1499_s6 = inlined_call_operand.vmem [shape: f32[1,128], index: 6, kind: input, shape index: {}]   ;;  %s1500_s7 = inlined_call_operand.hbm [shape: f32[32,128], index: 7, kind: output, shape index: {}]  }
   0x1   :  { %13 = vsyncpa [#allocation6], 0 }
   0x2   :  { %14 = vsyncpa [#allocation9], 0 }
   0x3   :  { %15 = vsyncpa [#allocation4], 0  ;;  %s1409_s24 = smov [#allocation5]  }
   0x4   :  { %s33_s25 = sshll.u32 %s1409_s24, 4  ;;  %s34_s25 = int_to_ptr.vmem [resolvable:$true] %s33_s25 }
   0x5   :  { %s1309_s26 = scalar_lea.vmem %s34_s25, 6272  ;;  %p1314_p1 = scmp.lt.s32.totalorder %s34_s25, %s34_s25 }
   0x6   :  { %p1310_p0 = scmp.ne.s32.totalorder %s34_s25, %s1309_s26  ;;  %p1315_p2 = scmp.lt.s32.totalorder %s1309_s26, %s1309_s26 }
   0x8   :  { %p1316_p3 = por %p1315_p2, %p1314_p1 }
   0xa   :  { %p1317_p4 = pnand %p1316_p3, %p1310_p0 }
   0xc   :  { %1320 = shalt.err (!%p1317_p4)
}
   0xd   :  { %s1410_s27 = smov 64   ;;  %s1411_s28 = smov 4  }
   0xe   :  { %39 = dma.hbm_to_vmem [thread:$0]  %s1494_s1, 6272, %s34_s25, [#allocation6], %s1410_s27, %s1410_s27, %s1411_s28  }
   0xf   :  { %s1412_s8 = smov [#allocation2]  }
  0x10   :  { %s21_s9 = sshll.u32 %s1412_s8, 4  ;;  %s22_s9 = int_to_ptr.vmem [resolvable:$true] %s21_s9 }
  0x11   :  { %s1329_s10 = scalar_lea.vmem %s22_s9, 3584  ;;  %p1334_p6 = scmp.lt.s32.totalorder %s22_s9, %s22_s9 }
  0x12   :  { %p1330_p5 = scmp.ne.s32.totalorder %s22_s9, %s1329_s10  ;;  %p1335_p7 = scmp.lt.s32.totalorder %s1329_s10, %s1329_s10 }
  0x14   :  { %p1336_p8 = por %p1335_p7, %p1334_p6 }
  0x16   :  { %p1337_p9 = pnand %p1336_p8, %p1330_p5 }
  0x18   :  { %1340 = shalt.err (!%p1337_p9)
}
  0x19   :  { %s1413_s11 = smov 896   ;;  %s1414_s12 = smov 56  }
  0x1a   :  { %27 = dma.hbm_to_vmem [thread:$0]  %s1493_s0, 3584, %s22_s9, [#allocation3], %s1413_s11, %s1413_s11, %s1414_s12  }
  0x1b   :  { %s1415_s15 = smov [#allocation7]   ;;  %s1416_s17 = smov [#allocation8]  }
  0x1c   :  { %s47_s16 = sshll.u32 %s1415_s15, 4  ;;  %s61_s1 = sshll.u32 %s1416_s17, 4  ;;  %s48_s16 = int_to_ptr.vmem [resolvable:$true] %s47_s16  ;;  %s62_s1 = int_to_ptr.vmem [resolvable:$true] %s61_s1 }
  0x1d   :  { %s1349_s18 = scalar_lea.vmem %s48_s16, 1024  ;;  %p1354_p11 = scmp.lt.s32.totalorder %s48_s16, %s48_s16 }
  0x1e   :  { %p1350_p10 = scmp.ne.s32.totalorder %s48_s16, %s1349_s18  ;;  %p1355_p12 = scmp.lt.s32.totalorder %s1349_s18, %s1349_s18 }
  0x20   :  { %p1356_p13 = por %p1355_p12, %p1354_p11 }
  0x22   :  { %p1357_p0 = pnand %p1356_p13, %p1350_p10 }
  0x24   :  { %1360 = shalt.err (!%p1357_p0)
}
  0x25   :  { %53 = dma.hbm_to_vmem [thread:$0]  %s1496_s3, 1024, %s48_s16, [#allocation6], %s1410_s27, %s1410_s27, %s1411_s28  }
  0x26   :  { %s1369_s0 = scalar_lea.vmem %s62_s1, 1024  ;;  %p1374_p2 = scmp.lt.s32.totalorder %s62_s1, %s62_s1 }
  0x27   :  { %p1370_p1 = scmp.ne.s32.totalorder %s62_s1, %s1369_s0  ;;  %p1375_p3 = scmp.lt.s32.totalorder %s1369_s0, %s1369_s0 }
  0x29   :  { %p1376_p4 = por %p1375_p3, %p1374_p2 }
  0x2b   :  { %p1377_p5 = pnand %p1376_p4, %p1370_p1 }
  0x2d   :  { %1380 = shalt.err (!%p1377_p5)
}
  0x2e   :  { %67 = dma.hbm_to_vmem [thread:$0]  %s1498_s5, 1024, %s62_s1, [#allocation9], %s1410_s27, %s1410_s27, %s1411_s28  }
  0x2f   :  { %1401 = dma.done.wait [#allocation3], 3584  }
  0x30   :  { %1402 = vsyncadd [#allocation3], 4294963712 }
  0x31   :  { %1403 = dma.done.wait [#allocation6], 7296  }
  0x32   :  { %1404 = vsyncadd [#allocation6], 4294960000 }
  0x33   :  { %1405 = dma.done.wait [#allocation9], 1024  }
  0x34   :  { %1406 = vsyncadd [#allocation9], 4294966272  ;;  %v1236_v0 = vld [vmem:[#allocation5 + $0x78] sm:$0xff]   ;;  %v1240_v4 = vld [vmem:[#allocation5 + $0x70] sm:$0xff]   ;;  %vm524_vm0 = vcmask 130048  }
  0x35   :  { %v1237_v1 = vld [vmem:[#allocation5 + $0x38] sm:$0xff]   ;;  %1072 = vmatprep.subr.bf16.mxu0 %v1236_v0  ;;  %v1241_v5 = vld [vmem:[#allocation5 + $0x30] sm:$0xff]   ;;  %v1244_v8 = vld [vmem:[#allocation5 + $0x68] sm:$0xff]  }
  0x36   :  { %v1238_v2 = vld [vmem:[#allocation5 + $0xf8] sm:$0xff]   ;;  %1073 = vmatpush3.bf16.msra.mxu0 %v1237_v1  ;;  %v1242_v6 = vld [vmem:[#allocation5 + $0xf0] sm:$0xff]   ;;  %v1245_v9 = vld [vmem:[#allocation5 + $0x28] sm:$0xff]  }
  0x37   :  { %v1239_v3 = vld [vmem:[#allocation5 + $0xb8] sm:$0xff]   ;;  %1100 = vmatprep.subr.bf16.mxu1 %v1238_v2  ;;  %1074 = vmatprep.subr.bf16.mxu0 %v1240_v4  ;;  %v1243_v7 = vld [vmem:[#allocation5 + $0xb0] sm:$0xff]   ;;  %v1246_v10 = vld [vmem:[#allocation5 + $0xe8] sm:$0xff]  }
  0x38   :  { %1101 = vmatpush3.bf16.msra.mxu1 %v1239_v3  ;;  %v1247_v11 = vld [vmem:[#allocation5 + $0xa8] sm:$0xff]   ;;  %v1248_v12 = vld [vmem:[#allocation5 + $0x60] sm:$0xff]   ;;  %v1252_v16 = vld [vmem:[#allocation5 + $0x58] sm:$0xff]  }
  0x39   :  { %1102 = vmatprep.subr.bf16.mxu1 %v1242_v6  ;;  %v1249_v13 = vld [vmem:[#allocation5 + $0x20] sm:$0xff]   ;;  %v1253_v17 = vld [vmem:[#allocation5 + $0x18] sm:$0xff]   ;;  %v1256_v20 = vld [vmem:[#allocation5 + $0x50] sm:$0xff]  }
  0x3a   :  { %1075 = vmatpush3.bf16.msra.mxu0 %v1241_v5  ;;  %v1250_v14 = vld [vmem:[#allocation5 + $0xe0] sm:$0xff]   ;;  %v1254_v18 = vld [vmem:[#allocation5 + $0xd8] sm:$0xff]   ;;  %v1257_v21 = vld [vmem:[#allocation5 + $0x10] sm:$0xff]  }
  0x3b   :  { %1076 = vmatprep.subr.bf16.mxu0 %v1244_v8  ;;  %v1251_v15 = vld [vmem:[#allocation5 + $0xa0] sm:$0xff]   ;;  %v1255_v19 = vld [vmem:[#allocation5 + $0x98] sm:$0xff]   ;;  %v1258_v22 = vld [vmem:[#allocation5 + $0xd0] sm:$0xff]  }
  0x3c   :  { %1103 = vmatpush3.bf16.msra.mxu1 %v1243_v7  ;;  %v1259_v23 = vld [vmem:[#allocation5 + $0x90] sm:$0xff]   ;;  %v1260_v24 = vld [vmem:[#allocation5 + $0x48] sm:$0xff]   ;;  %v1264_v28 = vld [vmem:[#allocation5 + $0x40] sm:$0xff]  }
  0x3d   :  { %1104 = vmatprep.subr.bf16.mxu1 %v1246_v10  ;;  %v1261_v25 = vld [vmem:[#allocation5 + $0x8] sm:$0xff]   ;;  %v1265_v29 = vld [vmem:[#allocation5] sm:$0xff]   ;;  %v90_v36 = vld [vmem:[#allocation2 + $0x38] sm:$0xff] }
  0x3e   :  { %1077 = vmatpush3.bf16.msra.mxu0 %v1245_v9  ;;  %v1262_v26 = vld [vmem:[#allocation5 + $0xc8] sm:$0xff]   ;;  %v1266_v30 = vld [vmem:[#allocation5 + $0xc0] sm:$0xff]   ;;  %v1268_v38 = vld [vmem:[#allocation5 + $0x178] sm:$0xff]  }
  0x3f   :  { %1078 = vmatprep.subr.bf16.mxu0 %v1248_v12  ;;  %v1263_v27 = vld [vmem:[#allocation5 + $0x88] sm:$0xff]   ;;  %v91_v32 = vld [vmem:[#allocation2 + $0x40] sm:$0xff]  ;;  %v86_v39 = vld [vmem:[#allocation2 + $0x18] sm:$0xff] }
  0x40   :  { %1105 = vmatpush3.bf16.msra.mxu1 %v1247_v11  ;;  %v84_v31 = vld [vmem:[#allocation2 + $0x8] sm:$0xff]  ;;  %v1267_v34 = vld [vmem:[#allocation5 + $0x80] sm:$0xff]   ;;  %v93_v40 = vld [vmem:[#allocation2 + $0x50] sm:$0xff] }
  0x41   :  { %1106 = vmatprep.subr.bf16.mxu1 %v1250_v14  ;;  %v112_v33 = vpack.c.bf16 %v91_v32, %v84_v31  ;;  %v83_v35 = vld [vmem:[#allocation2] sm:$0xff]  ;;  %v114_v41 = vpack.c.bf16 %v93_v40, %v86_v39  ;;  %v1269_v42 = vld [vmem:[#allocation5 + $0x138] sm:$0xff]   ;;  %v85_v43 = vld [vmem:[#allocation2 + $0x10] sm:$0xff] }
  0x42   :  { %1079 = vmatpush3.bf16.msra.mxu0 %v1249_v13  ;;  %v111_v37 = vpack.c.bf16 %v90_v36, %v83_v35  ;;  %v92_v44 = vld [vmem:[#allocation2 + $0x48] sm:$0xff]  ;;  %v1270_v46 = vld [vmem:[#allocation5 + $0x170] sm:$0xff]   ;;  %v1274_v50 = vld [vmem:[#allocation5 + $0x160] sm:$0xff]  }
  0x43   :  { %1080 = vmatprep.subr.bf16.mxu0 %v1252_v16  ;;  %563 = vmatprep.mubr.bf16.mxu0 %v112_v33  ;;  %v113_v45 = vpack.c.bf16 %v92_v44, %v85_v43  ;;  %v1271_v47 = vld [vmem:[#allocation5 + $0x130] sm:$0xff]   ;;  %v1272_v48 = vld [vmem:[#allocation5 + $0x168] sm:$0xff]   ;;  %v1275_v51 = vld [vmem:[#allocation5 + $0x120] sm:$0xff]  }
  0x44   :  { %1107 = vmatpush3.bf16.msra.mxu1 %v1251_v15  ;;  %612 = vmatprep.mubr.bf16.mxu1 %v114_v41  ;;  %v1273_v49 = vld [vmem:[#allocation5 + $0x128] sm:$0xff]   ;;  %v98_v52 = vld [vmem:[#allocation2 + $0x78] sm:$0xff]  ;;  %v105_v53 = vld [vmem:[#allocation2 + $0xb0] sm:$0xff] }
  0x45   :  { %1108 = vmatprep.subr.bf16.mxu1 %v1254_v18  ;;  %v1276_v54 = vld [vmem:[#allocation5 + $0x158] sm:$0xff]   ;;  %v119_v55 = vpack.c.bf16 %v105_v53, %v98_v52  ;;  %v97_v56 = vld [vmem:[#allocation2 + $0x70] sm:$0xff]  ;;  %v104_v57 = vld [vmem:[#allocation2 + $0xa8] sm:$0xff] }
  0x46   :  { %1081 = vmatpush3.bf16.msra.mxu0 %v1253_v17  ;;  %v118_v58 = vpack.c.bf16 %v104_v57, %v97_v56  ;;  %v100_v59 = vld [vmem:[#allocation2 + $0x88] sm:$0xff]  ;;  %v107_v60 = vld [vmem:[#allocation2 + $0xc0] sm:$0xff]  ;;  %v106_v63 = vld [vmem:[#allocation2 + $0xb8] sm:$0xff] }
  0x47   :  { %1082 = vmatprep.subr.bf16.mxu0 %v1256_v20  ;;  %v99_v61 = vld [vmem:[#allocation2 + $0x80] sm:$0xff]  ;;  %v121_v62 = vpack.c.bf16 %v107_v60, %v100_v59  ;;  %v1277_v1 = vld [vmem:[#allocation5 + $0x118] sm:$0xff]   ;;  %v1278_v2 = vld [vmem:[#allocation5 + $0x150] sm:$0xff]  }
  0x48   :  { %1109 = vmatpush3.bf16.msra.mxu1 %v1255_v19  ;;  %v120_v0 = vpack.c.bf16 %v106_v63, %v99_v61  ;;  %v1282_v3 = vld [vmem:[#allocation5 + $0x180] sm:$0xff]   ;;  %v1279_v4 = vld [vmem:[#allocation5 + $0x110] sm:$0xff]   ;;  %v1280_v5 = vld [vmem:[#allocation5 + $0x148] sm:$0xff]  }
  0x49   :  { %1110 = vmatprep.subr.bf16.mxu1 %v1258_v22  ;;  %v88_v6 = vld [vmem:[#allocation2 + $0x28] sm:$0xff]  ;;  %v95_v7 = vld [vmem:[#allocation2 + $0x60] sm:$0xff]  ;;  %v89_v9 = vld [vmem:[#allocation2 + $0x30] sm:$0xff] }
  0x4a   :  { %1083 = vmatpush3.bf16.msra.mxu0 %v1257_v21  ;;  %v116_v8 = vpack.c.bf16 %v95_v7, %v88_v6  ;;  %v96_v10 = vld [vmem:[#allocation2 + $0x68] sm:$0xff]  ;;  %v103_v11 = vld [vmem:[#allocation2 + $0xa0] sm:$0xff]  ;;  %v110_v12 = vld [vmem:[#allocation2 + $0xd8] sm:$0xff] }
  0x4b   :  { %1084 = vmatprep.subr.bf16.mxu0 %v1260_v24  ;;  %v1281_v13 = vld [vmem:[#allocation5 + $0x108] sm:$0xff]   ;;  %v117_v14 = vpack.c.bf16 %v96_v10, %v89_v9  ;;  %v124_v15 = vpack.c.bf16 %v110_v12, %v103_v11  ;;  %v1283_v16 = vld [vmem:[#allocation5 + $0x140] sm:$0xff]   ;;  %v94_v19 = vld [vmem:[#allocation2 + $0x58] sm:$0xff] }
  0x4c   :  { %1111 = vmatpush3.bf16.msra.mxu1 %v1259_v23  ;;  %v1284_v17 = vld [vmem:[#allocation5 + $0x100] sm:$0xff]   ;;  %v102_v20 = vld [vmem:[#allocation2 + $0x98] sm:$0xff]  ;;  %v109_v21 = vld [vmem:[#allocation2 + $0xd0] sm:$0xff] }
  0x4d   :  { %1112 = vmatprep.subr.bf16.mxu1 %v1262_v26  ;;  %v87_v18 = vld [vmem:[#allocation2 + $0x20] sm:$0xff]  ;;  %v123_v23 = vpack.c.bf16 %v109_v21, %v102_v20  ;;  %v101_v24 = vld [vmem:[#allocation2 + $0x90] sm:$0xff]  ;;  %v1290_v32 = vld [vmem:[#allocation7 + $0x10] sm:$0xff]  }
  0x4e   :  { %1085 = vmatpush3.bf16.msra.mxu0 %v1261_v25  ;;  %v115_v22 = vpack.c.bf16 %v94_v19, %v87_v18  ;;  %v108_v25 = vld [vmem:[#allocation2 + $0xc8] sm:$0xff]  ;;  %v1289_v31 = vld [vmem:[#allocation7 + $0x18] sm:$0xff]   ;;  %v1291_v33 = vld [vmem:[#allocation7 + $0x8] sm:$0xff]  }
  0x4f   :  { %1086 = vmatprep.subr.bf16.mxu0 %v1264_v28  ;;  %v122_v26 = vpack.c.bf16 %v108_v25, %v101_v24  ;;  %v1286_v28 = vld [vmem:[#allocation7 + $0x30] sm:$0xff]   ;;  %v1293_v35 = vld [vmem:[#allocation8 + $0x38] sm:$0xff]  }
  0x50   :  { %1113 = vmatpush3.bf16.msra.mxu1 %v1263_v27  ;;  %v1285_v27 = vld [vmem:[#allocation7 + $0x38] sm:$0xff]   ;;  %v1294_v36 = vld [vmem:[#allocation8 + $0x30] sm:$0xff]  }
  0x51   :  { %1114 = vmatprep.subr.bf16.mxu1 %v1266_v30  ;;  %v1288_v30 = vld [vmem:[#allocation7 + $0x20] sm:$0xff]   ;;  %v1297_v39 = vld [vmem:[#allocation8 + $0x18] sm:$0xff]  }
  0x52   :  { %1087 = vmatpush3.bf16.msra.mxu0 %v1265_v29  ;;  %v1287_v29 = vld [vmem:[#allocation7 + $0x28] sm:$0xff]   ;;  %v1002_v56 = vld [vmem:[%s1495_s2] ss:$0 sm:$0xff] }
  0x53   :  { %1128 = vmatprep.subr.bf16.mxu0 %v1268_v38  ;;  %v1296_v38 = vld [vmem:[#allocation8 + $0x20] sm:$0xff]  }
  0x54   :  { %1115 = vmatpush3.bf16.msra.mxu1 %v1267_v34  ;;  %v1292_v34 = vld [vmem:[#allocation7] sm:$0xff]  }
  0x55   :  { %564 = vmatmul.mubr.bf16.vlgmr.msra.gmra.mxu0 %v111_v37  ;;  %1179 = vmatprep.subr.bf16.mxu1 %v1282_v3  ;;  %v1295_v37 = vld [vmem:[#allocation8 + $0x28] sm:$0xff]  }
  0x56   :  { %1129 = vmatpush3.bf16.msra.mxu0 %v1269_v42  ;;  %571 = vmatprep.mubr.bf16.mxu0 %v119_v55 }
  0x57   :  { %613 = vmatmul.mubr.bf16.vlgmr.msra.gmra.mxu1 %v113_v45  ;;  %1130 = vmatprep.subr.bf16.mxu0 %v1270_v46 }
  0x58   :  { %620 = vmatprep.mubr.bf16.mxu1 %v121_v62  ;;  %1180 = vmatpush3.bf16.msra.mxu1 %v1282_v3 }
  0x59   :  { %1185 = vmatprep.subr.bf16.mxu1 %v1285_v27 }
  0x5a   :  { %1131 = vmatpush3.bf16.msra.mxu0 %v1271_v47 }
  0x5b   :  { %1132 = vmatprep.subr.bf16.mxu0 %v1272_v48 }
  0x5d   :  { %572 = vmatmul.mubr.bf16.gmra.mxu0 %v118_v58 }
  0x5e   :  { %1133 = vmatpush3.bf16.msra.mxu0 %v1273_v49  ;;  %661 = vmatprep.mubr.bf16.mxu0 %v116_v8 }
  0x5f   :  { %1134 = vmatprep.subr.bf16.mxu0 %v1274_v50  ;;  %621 = vmatmul.mubr.bf16.gmra.mxu1 %v120_v0 }
  0x60   :  { %1181 = vmatprep.mubr.msk.bf16.mxu1 %vm524_vm0, %v117_v14 }
  0x62   :  { %1135 = vmatpush3.bf16.msra.mxu0 %v1275_v51 }
  0x63   :  { %1136 = vmatprep.subr.bf16.mxu0 %v1276_v54 }
  0x66   :  { %1137 = vmatpush3.bf16.msra.mxu0 %v1277_v1 }
  0x67   :  { %1138 = vmatprep.subr.bf16.mxu0 %v1278_v2  ;;  %1182 = vmatmul.mubr.msk.bf16.vlgmr.msra.gmra.mxu1 %vm524_vm0, %v124_v15 }
  0x68   :  { %1186 = vmatpush3.bf16.msra.mxu1 %v1285_v27 }
  0x69   :  { %1187 = vmatprep.subr.bf16.mxu1 %v1286_v28 }
  0x6a   :  { %1139 = vmatpush3.bf16.msra.mxu0 %v1279_v4 }
  0x6b   :  { %1140 = vmatprep.subr.bf16.mxu0 %v1280_v5 }
  0x6c   :  { %1188 = vmatpush3.bf16.msra.mxu1 %v1286_v28 }
  0x6d   :  { %1189 = vmatprep.subr.bf16.mxu1 %v1287_v29 }
  0x6e   :  { %1141 = vmatpush3.bf16.msra.mxu0 %v1281_v13 }
  0x6f   :  { %1142 = vmatprep.subr.bf16.mxu0 %v1283_v16 }
  0x70   :  { %1190 = vmatpush3.bf16.msra.mxu1 %v1287_v29 }
  0x71   :  { %1191 = vmatprep.subr.bf16.mxu1 %v1288_v30 }
  0x72   :  { %1143 = vmatpush3.bf16.msra.mxu0 %v1284_v17 }
  0x73   :  { %1205 = vmatprep.subr.bf16.mxu0 %v1293_v35 }
  0x74   :  { %1192 = vmatpush3.bf16.msra.mxu1 %v1288_v30 }
  0x75   :  { %662 = vmatmul.mubr.bf16.vlgmr.msra.gmra.mxu0 %v115_v22  ;;  %1193 = vmatprep.subr.bf16.mxu1 %v1289_v31 }
  0x76   :  { %669 = vmatprep.mubr.bf16.mxu0 %v123_v23  ;;  %1206 = vmatpush3.bf16.msra.mxu0 %v1293_v35 }
  0x77   :  { %1207 = vmatprep.subr.bf16.mxu0 %v1294_v36 }
  0x78   :  { %1194 = vmatpush3.bf16.msra.mxu1 %v1289_v31 }
  0x79   :  { %1195 = vmatprep.subr.bf16.mxu1 %v1290_v32 }
  0x7a   :  { %1208 = vmatpush3.bf16.msra.mxu0 %v1294_v36 }
  0x7b   :  { %1209 = vmatprep.subr.bf16.mxu0 %v1295_v37 }
  0x7c   :  { %1196 = vmatpush3.bf16.msra.mxu1 %v1290_v32 }
  0x7d   :  { %670 = vmatmul.mubr.bf16.gmra.mxu0 %v122_v26  ;;  %1197 = vmatprep.subr.bf16.mxu1 %v1291_v33 }
  0x7e   :  { %1210 = vmatpush3.bf16.msra.mxu0 %v1295_v37 }
  0x7f   :  { %1211 = vmatprep.subr.bf16.mxu0 %v1296_v38 }
  0x80   :  { %1198 = vmatpush3.bf16.msra.mxu1 %v1291_v33 }
  0x81   :  { %1199 = vmatprep.subr.bf16.mxu1 %v1292_v34 }
  0x82   :  { %1212 = vmatpush3.bf16.msra.mxu0 %v1296_v38 }
  0x83   :  { %1213 = vmatprep.subr.bf16.mxu0 %v1297_v39 }
  0x84   :  { %1200 = vmatpush3.bf16.msra.mxu1 %v1292_v34 }
  0x86   :  { %1214 = vmatpush3.bf16.msra.mxu0 %v1297_v39  ;;  %v1298_v39 = vld [vmem:[#allocation8 + $0x10] sm:$0xff]  }
  0x87   :  { %1215 = vmatprep.subr.bf16.mxu0 %v1298_v39 }
  0x8a   :  { %1216 = vmatpush3.bf16.msra.mxu0 %v1298_v39 }
 0x115   :  { %v1088_v41 = vpop.f32.mrf.mxu0 }
 0x117   :  { %v1116_v40 = vpop.f32.mrf.mxu1  ;;  %v1089_v43 = vpop.f32.mrf.mxu0 }
 0x118   :  { %v1090_v55 = vadd.f32 %v1089_v43, %v1088_v41  ;;  %v1300_v41 = vld [vmem:[#allocation8] sm:$0xff]  }
 0x119   :  { %v1117_v42 = vpop.f32.mrf.mxu1  ;;  %v1091_v45 = vpop.f32.mrf.mxu0 }
 0x11a   :  { %v566_v59 = vadd.f32 %v1090_v55, %v1002_v56  ;;  %v1118_v60 = vadd.f32 %v1117_v42, %v1116_v40  ;;  %v1299_v40 = vld [vmem:[#allocation8 + $0x8] sm:$0xff]  }
 0x11b   :  { %v1119_v44 = vpop.f32.mrf.mxu1  ;;  %v1092_v48 = vpop.f32.mrf.mxu0  ;;  %1217 = vmatprep.subr.bf16.mxu0 %v1299_v40 }
 0x11c   :  { %v1093_v61 = vadd.f32 %v1092_v48, %v1091_v45  ;;  %v615_v2 = vadd.f32 %v1118_v60, %v566_v59  ;;  %1218 = vmatpush3.bf16.msra.mxu0 %v1299_v40 }
 0x11d   :  { %v1120_v46 = vpop.f32.mrf.mxu1  ;;  %v1094_v49 = vpop.f32.mrf.mxu0  ;;  %1219 = vmatprep.subr.bf16.mxu0 %v1300_v41 }
 0x11e   :  { %v569_v3 = vadd.f32 %v1093_v61, %v1002_v56  ;;  %v1121_v4 = vadd.f32 %v1120_v46, %v1119_v44  ;;  %v1054_v44 = vld [vmem:[%s1497_s4] ss:$0 sm:$0xff]  ;;  %s1417_s4 = smov [#allocation10]  }
 0x11f   :  { %v1122_v47 = vpop.f32.mrf.mxu1  ;;  %v1095_v51 = vpop.f32.mrf.mxu0  ;;  %s988_s26 = sshll.u32 %s1417_s4, 4  ;;  %s989_s26 = int_to_ptr.vmem [resolvable:$true] %s988_s26 }
 0x120   :  { %v1096_v0 = vadd.f32 %v1095_v51, %v1094_v49  ;;  %v618_v12 = vadd.f32 %v1121_v4, %v569_v3  ;;  %1220 = vmatpush3.bf16.msra.mxu0 %v1300_v41  ;;  %s1381_s27 = scalar_lea.vmem %s989_s26, 512  ;;  %p1386_p7 = scmp.lt.s32.totalorder %s989_s26, %s989_s26 }
 0x121   :  { %v1123_v50 = vpop.f32.mrf.mxu1  ;;  %v1097_v53 = vpop.f32.mrf.mxu0  ;;  %p1382_p6 = scmp.ne.s32.totalorder %s989_s26, %s1381_s27  ;;  %p1387_p8 = scmp.lt.s32.totalorder %s1381_s27, %s1381_s27 }
 0x122   :  { %v574_v9 = vadd.f32 %v1096_v0, %v1002_v56  ;;  %v1124_v10 = vadd.f32 %v1123_v50, %v1122_v47 }
 0x123   :  { %v1125_v52 = vpop.f32.mrf.mxu1  ;;  %v1098_v58 = vpop.f32.mrf.mxu0  ;;  %p1388_p9 = por %p1387_p8, %p1386_p7 }
 0x124   :  { %v1099_v13 = vadd.f32 %v1098_v58, %v1097_v53  ;;  %v623_v19 = vadd.f32 %v1124_v10, %v574_v9 }
 0x125   :  { %v1126_v54 = vpop.f32.mrf.mxu1  ;;  %p1389_p10 = pnand %p1388_p9, %p1382_p6 }
 0x126   :  { %v577_v21 = vadd.f32 %v1099_v13, %v1002_v56  ;;  %v1127_v22 = vadd.f32 %v1126_v54, %v1125_v52 }
 0x127   :  { %v1183_v57 = vpop.f32.mrf.mxu1 }
 0x128   :  { %v626_v30 = vadd.f32 %v1127_v22, %v577_v21 }
 0x129   :  { %v712_v63 = vpop.f32.mrf.mxu1 }
 0x12b   :  { %v1184_v7 = vpop.f32.mrf.mxu1 }
 0x12d   :  { %v715_v16 = vpop.f32.mrf.mxu1 }
 0x135   :  { %v1144_v62 = vpop.f32.mrf.mxu0 }
 0x137   :  { %v1145_v1 = vpop.f32.mrf.mxu0 }
 0x138   :  { %v1146_v5 = vadd.f32 %v1145_v1, %v1144_v62 }
 0x139   :  { %v1147_v6 = vpop.f32.mrf.mxu0 }
 0x13a   :  { %v664_v8 = vadd.f32 %v1146_v5, %v615_v2 }
 0x13b   :  { %v1148_v11 = vpop.f32.mrf.mxu0 }
 0x13c   :  { %v1149_v14 = vadd.f32 %v1148_v11, %v1147_v6  ;;  %v713_v17 = vadd.f32 %v712_v63, %v664_v8 }
 0x13d   :  { %v1150_v15 = vpop.f32.mrf.mxu0 }
 0x13e   :  { %v667_v18 = vadd.f32 %v1149_v14, %v618_v12  ;;  %v727_v26 = vmax.f32 %v713_v17, 0.0 }
 0x13f   :  { %v1151_v20 = vpop.f32.mrf.mxu0 }
 0x140   :  { %v1152_v23 = vadd.f32 %v1151_v20, %v1150_v15  ;;  %v716_v24 = vadd.f32 %v715_v16, %v667_v18 }
 0x141   :  { %v1153_v25 = vpop.f32.mrf.mxu0 }
 0x142   :  { %v672_v27 = vadd.f32 %v1152_v23, %v623_v19  ;;  %v728_v28 = vmax.f32 %v716_v24, 0.0 }
 0x143   :  { %v1154_v29 = vpop.f32.mrf.mxu0 }
 0x144   :  { %v731_v31 = vpack.c.bf16 %v728_v28, %v727_v26  ;;  %v1155_v32 = vadd.f32 %v1154_v29, %v1153_v25  ;;  %v721_v33 = vadd.f32 %v1183_v57, %v672_v27  ;;  %v1063_v57 = vld [vmem:[%s1499_s6] ss:$0 sm:$0xff] }
 0x146   :  { %v675_v34 = vadd.f32 %v1155_v32, %v626_v30  ;;  %1201 = vmatprep.mubr.bf16.mxu1 %v731_v31  ;;  %v729_v36 = vmax.f32 %v721_v33, 0.0 }
 0x148   :  { %v724_v35 = vadd.f32 %v1184_v7, %v675_v34 }
 0x14a   :  { %v730_v37 = vmax.f32 %v724_v35, 0.0 }
 0x14c   :  { %v732_v38 = vpack.c.bf16 %v730_v37, %v729_v36 }
 0x14e   :  { %1202 = vmatmul.mubr.bf16.vlgmr.msra.gmra.mxu1 %v732_v38 }
 0x20e   :  { %v1203_v42 = vpop.f32.mrf.mxu1 }
 0x20f   :  { %v847_v48 = vadd.f32 %v1203_v42, %v1054_v44 }
 0x210   :  { %v838_v43 = vpop.f32.mrf.mxu1 }
 0x211   :  { %v839_v46 = vadd.f32 %v1054_v44, %v838_v43  ;;  %v855_v54 = vmax.f32 %v847_v48, 0.0 }
 0x212   :  { %v1204_v45 = vpop.f32.mrf.mxu1 }
 0x213   :  { %v850_v47 = vadd.f32 %v1204_v45, %v1054_v44  ;;  %v853_v52 = vmax.f32 %v839_v46, 0.0 }
 0x214   :  { %v841_v49 = vpop.f32.mrf.mxu1 }
 0x215   :  { %v842_v50 = vadd.f32 %v1054_v44, %v841_v49  ;;  %v856_v51 = vmax.f32 %v850_v47, 0.0 }
 0x217   :  { %v854_v53 = vmax.f32 %v842_v50, 0.0  ;;  %v858_v56 = vpack.c.bf16 %v856_v51, %v855_v54 }
 0x219   :  { %v857_v55 = vpack.c.bf16 %v854_v53, %v853_v52 }
 0x21b   :  { %1221 = vmatprep.mubr.bf16.mxu0 %v857_v55 }
 0x21c   :  { %1222 = vmatmul.mubr.bf16.vlgmr.msra.gmra.mxu0 %v858_v56 }
 0x2dc   :  { %v1223_v58 = vpop.f32.mrf.mxu0 }
 0x2dd   :  { %v973_v59 = vadd.f32 %v1223_v58, %v1063_v57 }
 0x2de   :  { %v964_v60 = vpop.f32.mrf.mxu0 }
 0x2df   :  { %981 = vst [vmem:[#allocation10 + $0x10] sm:$0xff] %v973_v59  ;;  %v965_v61 = vadd.f32 %v1063_v57, %v964_v60 }
 0x2e0   :  { %v1224_v62 = vpop.f32.mrf.mxu0 }
 0x2e1   :  { %979 = vst [vmem:[#allocation10] sm:$0xff] %v965_v61  ;;  %v976_v63 = vadd.f32 %v1224_v62, %v1063_v57 }
 0x2e2   :  { %v967_v0 = vpop.f32.mrf.mxu0 }
 0x2e3   :  { %982 = vst [vmem:[#allocation10 + $0x18] sm:$0xff] %v976_v63  ;;  %v968_v1 = vadd.f32 %v1063_v57, %v967_v0 }
 0x2e5   :  { %980 = vst [vmem:[#allocation10 + $0x8] sm:$0xff] %v968_v1 }
 0x2e6   :  { %1392 = shalt.err (!%p1389_p10)
}
 0x2e7   :  { %s1418_s6 = smov 128   ;;  %s1419_s28 = smov 8  }
 0x2e8   :  { %994 = dma.vmem_to_hbm [thread:$0]  %s989_s26, 512, %s1500_s7, [#allocation4], %s1418_s6, %s1418_s6, %s1419_s28  }
 0x2e9   :  { %1407 = dma.done.wait [#allocation4], 512  }
 0x2ea   :  { %1408 = vsyncadd [#allocation4], 4294966784 }
 0x2eb   :  { %998 = vsyncpa [#allocation3], 1 }
 0x2ec   :  { %999 = vsyncpa [#allocation6], 1 }
 0x2ed   :  { %1000 = vsyncpa [#allocation9], 1 }
 0x2ee   :  { %1001 = vsyncpa [#allocation4], 1 }

</bundles_post_ra>
